<compile_context>
chip_gen: v7x
topology: tpu7x:2x2x1
jax: 0.10.0
libtpu: 0.0.40
codegen_flags: <defaults>
</compile_context>

<pallas_src>
import jax
import jax.numpy as jnp
from jax.experimental import pallas as pl
from jax.experimental.pallas import tpu as pltpu

BN_EPS = 1e-5  # PyTorch BatchNorm1d default eps


def _round_up(x, m):
    return ((x + m - 1) // m) * m


def _make_fused_kernel(real_b, tb):
    """Builds the fused inv_head kernel (closes over the real batch size)."""
    inv_b = 1.0 / float(real_b)

    def kernel(f_ref, w1_ref, gamma_ref, beta_ref, w2_ref, o_ref,
               h_ref, stat_ref, aff_ref):
        # f_ref:     (tb, feat_dim) f32   (cast to bf16 in-kernel)
        # w1_ref:    (feat_dim, 512) bf16 (VMEM-resident, constant index)
        # gamma/beta:(1, 512) f32
        # w2_ref:    (512, 256) bf16      (VMEM-resident, constant index)
        # o_ref:     (tb, 256) out_dtype  (written only in phase 1)
        # h_ref:     (n_tiles, tb, 512) bf16  scratch, batch-resident h
        # stat_ref:  (2, 512) f32             scratch, [sum(h), sum(h*h)]
        # aff_ref:   (2, 512) bf16            scratch, folded [scale, shift]
        phase = pl.program_id(0)
        i = pl.program_id(1)

        # ---------------- phase 0: h = f @ w1 + BN partial sums ----------------
        @pl.when(phase == 0)
        def _stage1():
            @pl.when(i == 0)
            def _init():
                stat_ref[...] = jnp.zeros_like(stat_ref)

            f = f_ref[...].astype(jnp.bfloat16)          # per-tile cast (hides under matmul)
            h = jnp.dot(f, w1_ref[...], preferred_element_type=jnp.float32)
            h_ref[i] = h.astype(jnp.bfloat16)            # stays in VMEM for phase 1

            # Cross-sublane reductions offloaded to the MXU (it has slack here):
            # sum(h) and sum(h*h) as ones-row matmuls; only h*h touches the VALU.
            ones_r = jnp.ones((1, tb), jnp.float32)
            s = jnp.dot(ones_r, h, preferred_element_type=jnp.float32)
            ss = jnp.dot(ones_r, h * h, preferred_element_type=jnp.float32)
            stat_ref[0:1, :] += s                        # two plain stores, no concat
            stat_ref[1:2, :] += ss

        # -------- phase 1: fold BN -> scale/shift, affine+ReLU (bf16), @ w2 ----
        @pl.when(phase == 1)
        def _stage2():
            @pl.when(i == 0)
            def _fold():
                # Train-mode batch stats (biased variance) over the REAL batch;
                # zero-padded rows contributed nothing (both Linears bias-free).
                mean = stat_ref[0:1, :] * inv_b
                var = jnp.maximum(stat_ref[1:2, :] * inv_b - mean * mean, 0.0)
                scale = gamma_ref[...] * jax.lax.rsqrt(var + BN_EPS)   # EUP slot
                shift = beta_ref[...] - mean * scale
                aff_ref[0:1, :] = scale.astype(aff_ref.dtype)
                aff_ref[1:2, :] = shift.astype(aff_ref.dtype)

            h = h_ref[i]                                              # bf16
            r = jnp.maximum(h * aff_ref[0:1, :] + aff_ref[1:2, :], 0.0)  # bf16 VPU
            o_ref[...] = jnp.dot(r, w2_ref[...],
                                 preferred_element_type=jnp.float32
                                 ).astype(o_ref.dtype)

    return kernel


def inv_head(features, w1, gamma, beta, w2, *, batch_tile=512,
             vmem_limit_bytes=48 * 1024 * 1024, out_dtype=jnp.float32):
    """inv_head forward (train-mode BatchNorm, matching a fresh nn.Module).

    features: (B, feat_dim) f32;  w1: (feat_dim, 512);  w2: (512, 256);
    gamma/beta: (512,).  Returns (B, 256) in `out_dtype`.

    batch_tile=512 amortizes per-grid-step overhead on all generations (the
    128x128 MXU on v5e simply iterates over M); it is an upper bound — small
    batches use a single sublane-aligned tile.
    """
    B, feat_dim = features.shape
    hid = w1.shape[1]
    out_dim = w2.shape[1]

    # Pad the batch so every tile is a full, sublane-aligned block.  Padded rows
    # are zero -> zero rows of h -> contribute nothing to sum / sum_sq (both
    # Linears are bias-free), and padded output rows are sliced off at the end.
    b8 = _round_up(B, 8)
    if b8 <= batch_tile:
        tb, b_pad = b8, b8
    else:
        tb, b_pad = batch_tile, _round_up(B, batch_tile)
    if b_pad > B:
        features = jnp.pad(features, ((0, b_pad - B), (0, 0)))
    n_tiles = b_pad // tb

    # Weights are reused by every tile -> pre-cast once in the wrapper.
    # Features are read once each -> kept f32 in HBM, cast per tile in-kernel.
    w1_bf = w1.astype(jnp.bfloat16)
    w2_bf = w2.astype(jnp.bfloat16)
    gamma2d = gamma.reshape(1, -1).astype(jnp.float32)
    beta2d = beta.reshape(1, -1).astype(jnp.float32)

    kernel = _make_fused_kernel(B, tb)

    out_itemsize = jnp.dtype(out_dtype).itemsize
    cost = pl.CostEstimate(
        flops=(2 * b_pad * feat_dim * hid          # Linear1
               + 4 * b_pad * hid                   # MXU stat reductions
               + 2 * b_pad * hid * out_dim),       # Linear2
        transcendentals=hid,                       # rsqrt over 512 channels
        bytes_accessed=(b_pad * feat_dim * 4       # features (f32, single pass)
                        + feat_dim * hid * 2       # w1 bf16
                        + hid * out_dim * 2        # w2 bf16
                        + 4 * hid * 4              # gamma/beta + stats
                        + b_pad * out_dim * out_itemsize))

    # Make sure the VMEM limit covers the batch-resident h scratch + buffers.
    needed = (n_tiles * tb * hid * 2               # h scratch (bf16)
              + 2 * tb * feat_dim * 4              # double-buffered feature tiles
              + 2 * feat_dim * hid * 2             # w1 buffers
              + 2 * hid * out_dim * 2              # w2 buffers
              + 2 * tb * out_dim * out_itemsize    # output tiles
              + 8 * hid * 4)                       # gamma/beta/stat/affine
    vmem_limit_bytes = max(vmem_limit_bytes, int(needed * 1.25))

    out = pl.pallas_call(
        kernel,
        grid=(2, n_tiles),  # (phase, batch tile); phase outermost
        in_specs=[
            # Features: tile i in phase 0; parked on block 0 in phase 1 (unread;
            # constant index => at most one extra fetch at the phase boundary).
            pl.BlockSpec((tb, feat_dim), lambda p, i: (i * (1 - p), 0)),
            # Constant-index weights / BN params stay VMEM-resident across tiles.
            # TODO(synk): pipeline_mode=pl.Buffered(1) would drop their second
            # pipeline buffer; omitted for lowering compatibility (saving is small).
            pl.BlockSpec((feat_dim, hid), lambda p, i: (0, 0)),
            pl.BlockSpec((1, hid), lambda p, i: (0, 0)),
            pl.BlockSpec((1, hid), lambda p, i: (0, 0)),
            pl.BlockSpec((hid, out_dim), lambda p, i: (0, 0)),
        ],
        # Output written only in phase 1; during phase 0 the (untouched) buffer is
        # parked on block 0, so no garbage ever reaches HBM and nothing is written
        # twice: block 0's first writeback happens after phase-1 tile 0 stores it.
        out_specs=pl.BlockSpec((tb, out_dim), lambda p, i: (i * p, 0)),
        out_shape=jax.ShapeDtypeStruct((b_pad, out_dim), out_dtype),
        scratch_shapes=[
            pltpu.VMEM((n_tiles, tb, hid), jnp.bfloat16),  # batch-resident h
            pltpu.VMEM((2, hid), jnp.float32),             # [sum, sum_sq]
            pltpu.VMEM((2, hid), jnp.bfloat16),            # folded [scale, shift]
        ],
        compiler_params=pltpu.CompilerParams(
            # Phase order and the shared h/stat scratch force sequential execution.
            dimension_semantics=("arbitrary", "arbitrary"),
            vmem_limit_bytes=vmem_limit_bytes),
        cost_estimate=cost,
    )(features, w1_bf, gamma2d, beta2d, w2_bf)

    return out[:B]


def make_params(key, feat_dim):
    """Deterministic parameter init mimicking PyTorch defaults."""
    k1, k2 = jax.random.split(key, 2)
    b1 = 1.0 / jnp.sqrt(feat_dim)
    w1 = jax.random.uniform(k1, (feat_dim, 512), jnp.float32, -b1, b1)
    b2 = 1.0 / jnp.sqrt(512.0)
    w2 = jax.random.uniform(k2, (512, 256), jnp.float32, -b2, b2)
    gamma = jnp.ones((512,), jnp.float32)   # BatchNorm1d weight default
    beta = jnp.zeros((512,), jnp.float32)   # BatchNorm1d bias default
    return w1, gamma, beta, w2


if __name__ == "__main__":
    key = jax.random.PRNGKey(0)
    kx, kp, kb = jax.random.split(key, 3)

    # Small, module-consistent shapes: NCHW image, feat_dim kept small.
    B, C, H, W = 2, 3, 16, 16
    feat_dim = 256

    x = jax.random.normal(kx, (B, C, H, W), jnp.float32)

    # TODO(synk): the real ResNet backbone is an injected external module; it is
    # replaced here by a deterministic stand-in (global average pool + linear
    # stub + relu) producing (B, feat_dim) features in plain JAX glue.
    w_stub = jax.random.normal(kb, (C, feat_dim), jnp.float32) / jnp.sqrt(C)
    features = jnp.maximum(jnp.mean(x, axis=(2, 3)) @ w_stub, 0.0)  # (B, feat_dim)

    w1, gamma, beta, w2 = make_params(kp, feat_dim)

    out = inv_head(features, w1, gamma, beta, w2)
    out = jax.block_until_ready(out)

    # Quantization-aware pure-JAX reference mirroring the kernel's numerics:
    # bf16 MXU operands with f32 accumulation, f32 BN statistics over the real B,
    # bf16-stored h, bf16 scale/shift and bf16 affine+ReLU, f32 output.
    fq = features.astype(jnp.bfloat16)
    w1q = w1.astype(jnp.bfloat16)
    w2q = w2.astype(jnp.bfloat16)
    h = jnp.dot(fq, w1q, preferred_element_type=jnp.float32)
    mu = h.mean(axis=0)
    vr = jnp.maximum((h * h).mean(axis=0) - mu * mu, 0.0)
    sc = gamma * jax.lax.rsqrt(vr + BN_EPS)
    sh = beta - mu * sc
    hq = h.astype(jnp.bfloat16)
    r = jnp.maximum(hq * sc.astype(jnp.bfloat16) + sh.astype(jnp.bfloat16), 0.0)
    ref = jnp.dot(r, w2q, preferred_element_type=jnp.float32)

    assert out.shape == (B, 256)
    err = jnp.max(jnp.abs(out - ref))
    tol = 2e-2 * jnp.maximum(1.0, jnp.max(jnp.abs(ref)))
    assert err < tol, (err, tol)

    print("KERNEL_OK")
</pallas_src>

<mosaic_0001>
module attributes {stable_mosaic.version = 11 : i64} {
  func.func @kernel(%arg0: i32, %arg1: i32, %arg2: memref<8x256xf32, #tpu.memory_space<vmem>>, %arg3: memref<256x512xbf16, #tpu.memory_space<vmem>>, %arg4: memref<1x512xf32, #tpu.memory_space<vmem>>, %arg5: memref<1x512xf32, #tpu.memory_space<vmem>>, %arg6: memref<512x256xbf16, #tpu.memory_space<vmem>>, %arg7: memref<8x256xf32, #tpu.memory_space<vmem>>, %arg8: memref<1x8x512xbf16, #tpu.memory_space<vmem>>, %arg9: memref<2x512xf32, #tpu.memory_space<vmem>>, %arg10: memref<2x512xbf16, #tpu.memory_space<vmem>>) attributes {dimension_semantics = [#tpu.dimension_semantics<arbitrary>, #tpu.dimension_semantics<arbitrary>], iteration_bounds = array<i64: 2, 1>, scalar_prefetch = 0 : i64, scratch_operands = 3 : i64, tpu.core_type = #tpu.core_type<tc>, window_params = [{transform_indices = @transform_0, window_bounds = array<i64: 8, 256>}, {pipeline_mode = #tpu.pipeline_mode<synchronous>, transform_indices = @transform_1, window_bounds = array<i64: 256, 512>}, {pipeline_mode = #tpu.pipeline_mode<synchronous>, transform_indices = @transform_2, window_bounds = array<i64: 1, 512>}, {pipeline_mode = #tpu.pipeline_mode<synchronous>, transform_indices = @transform_3, window_bounds = array<i64: 1, 512>}, {pipeline_mode = #tpu.pipeline_mode<synchronous>, transform_indices = @transform_4, window_bounds = array<i64: 512, 256>}, {transform_indices = @transform_5, window_bounds = array<i64: 8, 256>}]} {
    %c0_i32 = arith.constant 0 : i32
    %0 = arith.cmpi eq, %arg0, %c0_i32 : i32
    %1 = arith.extui %0 : i1 to i32
    %c0_i32_0 = arith.constant 0 : i32
    %2 = arith.cmpi ne, %1, %c0_i32_0 : i32
    scf.if %2 {
      %c0_i32_2 = arith.constant 0 : i32
      %6 = arith.cmpi eq, %arg1, %c0_i32_2 : i32
      %7 = arith.extui %6 : i1 to i32
      %c0_i32_3 = arith.constant 0 : i32
      %8 = arith.cmpi ne, %7, %c0_i32_3 : i32
      scf.if %8 {
        %cst_19 = arith.constant 0.000000e+00 : f32
        %28 = vector.broadcast %cst_19 : f32 to vector<2x512xf32>
        %c0_20 = arith.constant 0 : index
        %c0_21 = arith.constant 0 : index
        %29 = vector.load %arg9[%c0_20, %c0_21] : memref<2x512xf32, #tpu.memory_space<vmem>>, vector<2x512xf32>
        tpu.vector_store %arg9[%c0_20, %c0_21], %28 {strides = array<i32>} : memref<2x512xf32, #tpu.memory_space<vmem>>, vector<2x512xf32>,
      } else {
      }
      %c0 = arith.constant 0 : index
      %c0_4 = arith.constant 0 : index
      %9 = vector.load %arg2[%c0, %c0_4] : memref<8x256xf32, #tpu.memory_space<vmem>>, vector<8x256xf32>
      %10 = arith.truncf %9 : vector<8x256xf32> to vector<8x256xbf16>
      %c0_5 = arith.constant 0 : index
      %c0_6 = arith.constant 0 : index
      %11 = vector.load %arg3[%c0_5, %c0_6] : memref<256x512xbf16, #tpu.memory_space<vmem>>, vector<256x512xbf16>
      %cst = arith.constant dense<0.000000e+00> : vector<8x512xf32>
      %12 = tpu.matmul %10, %11, %cst {dimension_numbers = #tpu.dot_dimension_numbers<[1], [0], [0], [1], [0, 0, 1, 1], [], []>} : vector<8x256xbf16>, vector<256x512xbf16>, vector<8x512xf32> -> vector<8x512xf32>
      %13 = arith.truncf %12 : vector<8x512xf32> to vector<8x512xbf16>
      %14 = arith.index_cast %arg1 : i32 to index
      %c0_7 = arith.constant 0 : index
      %c0_8 = arith.constant 0 : index
      %15 = vector.load %arg8[%14, %c0_7, %c0_8] : memref<1x8x512xbf16, #tpu.memory_space<vmem>>, vector<1x8x512xbf16>
      %16 = vector.shape_cast %15 : vector<1x8x512xbf16> to vector<8x512xbf16>
      %17 = vector.shape_cast %13 : vector<8x512xbf16> to vector<1x8x512xbf16>
      tpu.vector_store %arg8[%14, %c0_7, %c0_8], %17 {strides = array<i32>} : memref<1x8x512xbf16, #tpu.memory_space<vmem>>, vector<1x8x512xbf16>,
      %cst_9 = arith.constant 1.000000e+00 : f32
      %18 = vector.broadcast %cst_9 : f32 to vector<1x8xf32>
      %cst_10 = arith.constant dense<0.000000e+00> : vector<1x512xf32>
      %19 = tpu.matmul %18, %12, %cst_10 {dimension_numbers = #tpu.dot_dimension_numbers<[1], [0], [0], [1], [0, 0, 1, 1], [], []>} : vector<1x8xf32>, vector<8x512xf32>, vector<1x512xf32> -> vector<1x512xf32>
      %20 = arith.mulf %12, %12 : vector<8x512xf32>
      %cst_11 = arith.constant dense<0.000000e+00> : vector<1x512xf32>
      %21 = tpu.matmul %18, %20, %cst_11 {dimension_numbers = #tpu.dot_dimension_numbers<[1], [0], [0], [1], [0, 0, 1, 1], [], []>} : vector<1x8xf32>, vector<8x512xf32>, vector<1x512xf32> -> vector<1x512xf32>
      %c0_12 = arith.constant 0 : index
      %c0_13 = arith.constant 0 : index
      %22 = vector.load %arg9[%c0_12, %c0_13] : memref<2x512xf32, #tpu.memory_space<vmem>>, vector<1x512xf32>
      %23 = arith.addf %22, %19 : vector<1x512xf32>
      %c0_14 = arith.constant 0 : index
      %c0_15 = arith.constant 0 : index
      %24 = vector.load %arg9[%c0_14, %c0_15] : memref<2x512xf32, #tpu.memory_space<vmem>>, vector<1x512xf32>
      tpu.vector_store %arg9[%c0_14, %c0_15], %23 {strides = array<i32>} : memref<2x512xf32, #tpu.memory_space<vmem>>, vector<1x512xf32>,
      %c1 = arith.constant 1 : index
      %c0_16 = arith.constant 0 : index
      %25 = vector.load %arg9[%c1, %c0_16] : memref<2x512xf32, #tpu.memory_space<vmem>>, vector<1x512xf32>
      %26 = arith.addf %25, %21 : vector<1x512xf32>
      %c1_17 = arith.constant 1 : index
      %c0_18 = arith.constant 0 : index
      %27 = vector.load %arg9[%c1_17, %c0_18] : memref<2x512xf32, #tpu.memory_space<vmem>>, vector<1x512xf32>
      tpu.vector_store %arg9[%c1_17, %c0_18], %26 {strides = array<i32>} : memref<2x512xf32, #tpu.memory_space<vmem>>, vector<1x512xf32>,
    } else {
    }
    %c1_i32 = arith.constant 1 : i32
    %3 = arith.cmpi eq, %arg0, %c1_i32 : i32
    %4 = arith.extui %3 : i1 to i32
    %c0_i32_1 = arith.constant 0 : i32
    %5 = arith.cmpi ne, %4, %c0_i32_1 : i32
    scf.if %5 {
      %c0_i32_2 = arith.constant 0 : i32
      %6 = arith.cmpi eq, %arg1, %c0_i32_2 : i32
      %7 = arith.extui %6 : i1 to i32
      %c0_i32_3 = arith.constant 0 : i32
      %8 = arith.cmpi ne, %7, %c0_i32_3 : i32
      scf.if %8 {
        %c0_13 = arith.constant 0 : index
        %c0_14 = arith.constant 0 : index
        %23 = vector.load %arg9[%c0_13, %c0_14] : memref<2x512xf32, #tpu.memory_space<vmem>>, vector<1x512xf32>
        %cst_15 = arith.constant 5.000000e-01 : f32
        %24 = vector.broadcast %cst_15 : f32 to vector<1x512xf32>
        %25 = arith.mulf %23, %24 : vector<1x512xf32>
        %c1_16 = arith.constant 1 : index
        %c0_17 = arith.constant 0 : index
        %26 = vector.load %arg9[%c1_16, %c0_17] : memref<2x512xf32, #tpu.memory_space<vmem>>, vector<1x512xf32>
        %cst_18 = arith.constant 5.000000e-01 : f32
        %27 = vector.broadcast %cst_18 : f32 to vector<1x512xf32>
        %28 = arith.mulf %26, %27 : vector<1x512xf32>
        %29 = arith.mulf %25, %25 : vector<1x512xf32>
        %30 = arith.subf %28, %29 : vector<1x512xf32>
        %cst_19 = arith.constant 0.000000e+00 : f32
        %31 = vector.broadcast %cst_19 : f32 to vector<1x512xf32>
        %32 = arith.maximumf %30, %31 : vector<1x512xf32>
        %c0_20 = arith.constant 0 : index
        %c0_21 = arith.constant 0 : index
        %33 = vector.load %arg4[%c0_20, %c0_21] : memref<1x512xf32, #tpu.memory_space<vmem>>, vector<1x512xf32>
        %cst_22 = arith.constant 9.99999974E-6 : f32
        %34 = vector.broadcast %cst_22 : f32 to vector<1x512xf32>
        %35 = arith.addf %32, %34 : vector<1x512xf32>
        %36 = math.rsqrt %35 : vector<1x512xf32>
        %37 = arith.mulf %33, %36 : vector<1x512xf32>
        %c0_23 = arith.constant 0 : index
        %c0_24 = arith.constant 0 : index
        %38 = vector.load %arg5[%c0_23, %c0_24] : memref<1x512xf32, #tpu.memory_space<vmem>>, vector<1x512xf32>
        %39 = arith.mulf %25, %37 : vector<1x512xf32>
        %40 = arith.subf %38, %39 : vector<1x512xf32>
        %41 = arith.truncf %37 : vector<1x512xf32> to vector<1x512xbf16>
        %c0_25 = arith.constant 0 : index
        %c0_26 = arith.constant 0 : index
        %42 = vector.load %arg10[%c0_25, %c0_26] : memref<2x512xbf16, #tpu.memory_space<vmem>>, vector<1x512xbf16>
        tpu.vector_store %arg10[%c0_25, %c0_26], %41 {strides = array<i32>} : memref<2x512xbf16, #tpu.memory_space<vmem>>, vector<1x512xbf16>,
        %43 = arith.truncf %40 : vector<1x512xf32> to vector<1x512xbf16>
        %c1_27 = arith.constant 1 : index
        %c0_28 = arith.constant 0 : index
        %44 = vector.load %arg10[%c1_27, %c0_28] : memref<2x512xbf16, #tpu.memory_space<vmem>>, vector<1x512xbf16>
        tpu.vector_store %arg10[%c1_27, %c0_28], %43 {strides = array<i32>} : memref<2x512xbf16, #tpu.memory_space<vmem>>, vector<1x512xbf16>,
      } else {
      }
      %9 = arith.index_cast %arg1 : i32 to index
      %c0 = arith.constant 0 : index
      %c0_4 = arith.constant 0 : index
      %10 = vector.load %arg8[%9, %c0, %c0_4] : memref<1x8x512xbf16, #tpu.memory_space<vmem>>, vector<1x8x512xbf16>
      %11 = vector.shape_cast %10 : vector<1x8x512xbf16> to vector<8x512xbf16>
      %c0_5 = arith.constant 0 : index
      %c0_6 = arith.constant 0 : index
      %12 = vector.load %arg10[%c0_5, %c0_6] : memref<2x512xbf16, #tpu.memory_space<vmem>>, vector<1x512xbf16>
      %13 = vector.broadcast %12 : vector<1x512xbf16> to vector<8x512xbf16>
      %14 = arith.mulf %11, %13 : vector<8x512xbf16>
      %c1 = arith.constant 1 : index
      %c0_7 = arith.constant 0 : index
      %15 = vector.load %arg10[%c1, %c0_7] : memref<2x512xbf16, #tpu.memory_space<vmem>>, vector<1x512xbf16>
      %16 = vector.broadcast %15 : vector<1x512xbf16> to vector<8x512xbf16>
      %17 = arith.addf %14, %16 : vector<8x512xbf16>
      %cst = arith.constant 0.000000e+00 : bf16
      %18 = vector.broadcast %cst : bf16 to vector<8x512xbf16>
      %19 = arith.maximumf %17, %18 : vector<8x512xbf16>
      %c0_8 = arith.constant 0 : index
      %c0_9 = arith.constant 0 : index
      %20 = vector.load %arg6[%c0_8, %c0_9] : memref<512x256xbf16, #tpu.memory_space<vmem>>, vector<512x256xbf16>
      %cst_10 = arith.constant dense<0.000000e+00> : vector<8x256xf32>
      %21 = tpu.matmul %19, %20, %cst_10 {dimension_numbers = #tpu.dot_dimension_numbers<[1], [0], [0], [1], [0, 0, 1, 1], [], []>} : vector<8x512xbf16>, vector<512x256xbf16>, vector<8x256xf32> -> vector<8x256xf32>
      %c0_11 = arith.constant 0 : index
      %c0_12 = arith.constant 0 : index
      %22 = vector.load %arg7[%c0_11, %c0_12] : memref<8x256xf32, #tpu.memory_space<vmem>>, vector<8x256xf32>
      tpu.vector_store %arg7[%c0_11, %c0_12], %21 {strides = array<i32>} : memref<8x256xf32, #tpu.memory_space<vmem>>, vector<8x256xf32>,
    } else {
    }
    return
  }
  func.func @transform_0(%arg0: i32, %arg1: i32) -> (i32, i32) {
    %c1_i32 = arith.constant 1 : i32
    %0 = arith.subi %c1_i32, %arg0 : i32
    %1 = arith.muli %arg1, %0 : i32
    %c0_i32 = arith.constant 0 : i32
    %c0_i32_0 = arith.constant 0 : i32
    return %1, %c0_i32 : i32, i32
  }
  func.func @transform_1(%arg0: i32, %arg1: i32) -> (i32, i32) {
    %c0_i32 = arith.constant 0 : i32
    %c0_i32_0 = arith.constant 0 : i32
    %c0_i32_1 = arith.constant 0 : i32
    return %c0_i32, %c0_i32_0 : i32, i32
  }
  func.func @transform_2(%arg0: i32, %arg1: i32) -> (i32, i32) {
    %c0_i32 = arith.constant 0 : i32
    %c0_i32_0 = arith.constant 0 : i32
    %c0_i32_1 = arith.constant 0 : i32
    return %c0_i32, %c0_i32_0 : i32, i32
  }
  func.func @transform_3(%arg0: i32, %arg1: i32) -> (i32, i32) {
    %c0_i32 = arith.constant 0 : i32
    %c0_i32_0 = arith.constant 0 : i32
    %c0_i32_1 = arith.constant 0 : i32
    return %c0_i32, %c0_i32_0 : i32, i32
  }
  func.func @transform_4(%arg0: i32, %arg1: i32) -> (i32, i32) {
    %c0_i32 = arith.constant 0 : i32
    %c0_i32_0 = arith.constant 0 : i32
    %c0_i32_1 = arith.constant 0 : i32
    return %c0_i32, %c0_i32_0 : i32, i32
  }
  func.func @transform_5(%arg0: i32, %arg1: i32) -> (i32, i32) {
    %0 = arith.muli %arg1, %arg0 : i32
    %c0_i32 = arith.constant 0 : i32
    %c0_i32_0 = arith.constant 0 : i32
    return %0, %c0_i32 : i32, i32
  }
}

</mosaic_0001>

<bundles_post_ra>
// kernel: tpu_custom_call.1
= control target key start
LH: loop header
LB: loop body
LE: loop exit
PB: predicated region body
PF: predicated region fallthrough
CT: control target
= control target key end

     0   :  { %10 = vsyncpa [#allocation6], 0  ;;  %s2891_s0 = inlined_call_operand.hbm [shape: f32[8,256], index: 0, kind: input, shape index: {}]   ;;  %s2892_s1 = inlined_call_operand.hbm [shape: bf16[256,512], index: 1, kind: input, shape index: {}]   ;;  %s2893_s2 = inlined_call_operand.vmem [shape: f32[1,512], index: 2, kind: input, shape index: {}]   ;;  %s2894_s3 = inlined_call_operand.vmem [shape: f32[1,512], index: 3, kind: input, shape index: {}]   ;;  %s2895_s4 = inlined_call_operand.hbm [shape: bf16[512,256], index: 4, kind: input, shape index: {}]   ;;  %s2896_s5 = inlined_call_operand.hbm [shape: f32[8,256], index: 5, kind: output, shape index: {}]  }
   0x1   :  { %12 = vsyncpa [#allocation6 + $0x1], 0 }
   0x2   :  { %13 = vsyncpa [#allocation9], 0 }
   0x3   :  { %14 = vsyncpa [#allocation7], 0 }
   0x4   :  { %16 = vsyncpa [#allocation7 + $0x1], 0  ;;  %s2666_s18 = smov 0   ;;  %s2668_s19 = smov 0  }
   0x5   :  { %s2670_s20 = smov 0  }
   0x6 LB: > { %s2037_s21 = sadd.s32 4294967295, %s2621_s20   ;;  %s2038_s22 = sadd.s32 4294967294, %s2621_s20   ;;  %s2621_s20 = sphi %s2670_s20, %s22_s20   ;;  %s2617_s19 = sphi %s2668_s19, %s2921_s19   ;;  %s2613_s18 = sphi %s2666_s18, %s2920_s18  }
   0x7   : > { %s34_s23 = sadd.s32 1, %s2617_s19  ;;  %p2039_p0 = scmp.ge.s32.totalorder %s2621_s20, 1 }
   0x8   : > { %p36_p1 = scmp.ge.s32.totalorder %s34_s23, 2  ;;  %p181_p2 = scmp.lt.s32.totalorder %s2621_s20, 3 }
   0x9   : > { %p2688_p3 = scmp.eq.s32.totalorder %s2037_s21, 0  ;;  %s2623_s26 = smov [#allocation8]  }
   0xa   : > { %s2923_s23 = smov (%p36_p1, %s34_s23), 0  ;;  %p2694_p4 = pnand %p2039_p0, %p181_p2 }
   0xb   : > { %s2900_s24 = scalar_select %p2688_p3, 1, 0 }
   0xc   : > { %s2901_s25 = scalar_select %p2694_p4, 1, 0 }
   0xd   : > { %s193_s27 = sshll.u32 %s2623_s26, 4  ;;  %p2221_p5 = pneg %p2694_p4  ;;  %s194_s27 = int_to_ptr.vmem [resolvable:$true] %s193_s27 }
   0xe   : > { %s2624_s29 = smov [#allocation10]   ;;  %s2477_s8 = scalar_lea.hbm %s2892_s1, 8192 }
   0xf   : > { %p2703_p7 = pnand %p2688_p3, %p2221_p5  ;;  %s212_s30 = sshll.u32 %s2624_s29, 4  ;;  %s213_s30 = int_to_ptr.vmem [resolvable:$true] %s212_s30 }
  0x10   : > { %p2478_p8 = scmp.ne.s32.totalorder %s2892_s1, %s2477_s8  ;;  %p2484_p12 = scmp.lt.u32.totalorder %s2477_s8, %s2892_s1 }
  0x11   : > { %p2479_p9 = pneg %p2703_p7 }
  0x13   : > { %p2480_p10 = pnand %p2479_p9, %p2478_p8 }
  0x15   : > { %p2481_p11 = pneg %p2480_p10 }
  0x17   : > { %p2486_p13 = pnand %p2484_p12, %p2481_p11 }
  0x19   : > { %2489 = shalt.err (!%p2486_p13)
}
  0x1a   : > { %s2490_s13 = scalar_lea.vmem %s194_s27, 8192  ;;  %p2498_p5 = scmp.lt.s32.totalorder %s194_s27, %s194_s27 }
  0x1b   : > { %p2491_p0 = scmp.ne.s32.totalorder %s194_s27, %s2490_s13  ;;  %p2499_p6 = scmp.lt.s32.totalorder %s2490_s13, %s2490_s13 }
  0x1d   : > { %p2493_p1 = pnand %p2491_p0, %p2479_p9  ;;  %p2500_p3 = por %p2499_p6, %p2498_p5 }
  0x1f   : > { %p2494_p2 = pneg %p2493_p1 }
  0x21   : > { %p2501_p4 = pnand %p2500_p3, %p2494_p2 }
  0x23   : > { %2504 = shalt.err (!%p2501_p4)
}
  0x24   : > { %s2625_s14 = smov 256   ;;  %s2626_s15 = smov 16  }
  0x25   : > { %2224 = dma.hbm_to_vmem [thread:$0]  (!%p2703_p7), %s2892_s1, 8192, %s194_s27, [#allocation9], %s2625_s14, %s2625_s14, %s2626_s15  }
  0x26   : > { %s2505_s6 = scalar_lea.hbm %s2895_s4, 8192 }
  0x27   : > { %p2506_p6 = scmp.ne.s32.totalorder %s2895_s4, %s2505_s6  ;;  %p2512_p8 = scmp.lt.u32.totalorder %s2505_s6, %s2895_s4 }
  0x29   : > { %p2508_p3 = pnand %p2506_p6, %p2479_p9 }
  0x2b   : > { %p2509_p4 = pneg %p2508_p3 }
  0x2d   : > { %p2514_p10 = pnand %p2512_p8, %p2509_p4 }
  0x2f   : > { %2517 = shalt.err (!%p2514_p10)
}
  0x30   : > { %s2518_s27 = scalar_lea.vmem %s213_s30, 8192  ;;  %p2526_p0 = scmp.lt.s32.totalorder %s213_s30, %s213_s30 }
  0x31   : > { %p2519_p11 = scmp.ne.s32.totalorder %s213_s30, %s2518_s27  ;;  %p2527_p1 = scmp.lt.s32.totalorder %s2518_s27, %s2518_s27 }
  0x33   : > { %p2521_p12 = pnand %p2519_p11, %p2479_p9  ;;  %p2528_p2 = por %p2527_p1, %p2526_p0 }
  0x35   : > { %p2522_p13 = pneg %p2521_p12 }
  0x37   : > { %p2529_p5 = pnand %p2528_p2, %p2522_p13 }
  0x39   : > { %2532 = shalt.err (!%p2529_p5)
}
  0x3a   : > { %s2627_s11 = smov 128   ;;  %s2628_s12 = smov 8  }
  0x3b   : > { %2227 = dma.hbm_to_vmem [thread:$0]  (!%p2703_p7), %s2895_s4, 8192, %s213_s30, [#allocation9], %s2627_s11, %s2627_s11, %s2628_s12  }
  0x3c   : > { %p2238_p6 = scmp.lt.s32.totalorder %s2621_s20, 2  ;;  %p2239_p3 = scmp.eq.s32.totalorder %s2621_s20, 0 }
  0x3d   : > { %s2629_s15 = smov [#allocation5]   ;;  %s2533_s6 = scalar_lea.hbm %s2891_s0, 256 }
  0x3e   : > { %s240_s16 = sshll.u32 %s2629_s15, 4  ;;  %p2751_p9 = pnand %p2239_p3, %p2238_p6  ;;  %s241_s16 = int_to_ptr.vmem [resolvable:$true] %s240_s16 }
  0x3f   : > { %p2534_p4 = scmp.ne.s32.totalorder %s2891_s0, %s2533_s6  ;;  %p2540_p11 = scmp.lt.u32.totalorder %s2533_s6, %s2891_s0 }
  0x40   : > { %p2535_p7 = pneg %p2751_p9 }
  0x42   : > { %p2536_p8 = pnand %p2535_p7, %p2534_p4 }
  0x44   : > { %p2537_p10 = pneg %p2536_p8 }
  0x46   : > { %p2542_p12 = pnand %p2540_p11, %p2537_p10 }
  0x48   : > { %2545 = shalt.err (!%p2542_p12)
}
  0x49   : > { %s2546_s9 = scalar_lea.vmem %s241_s16, 256  ;;  %s2553_s10 = scalar_lea.vmem %s241_s16, 512 }
  0x4a   : > { %p2547_p13 = scmp.ne.s32.totalorder %s241_s16, %s2546_s9  ;;  %p2554_p2 = scmp.lt.s32.totalorder %s241_s16, %s241_s16 }
  0x4b   : > { %p2555_p5 = scmp.lt.s32.totalorder %s2553_s10, %s2546_s9 }
  0x4c   : > { %p2549_p0 = pnand %p2547_p13, %p2535_p7 }
  0x4d   : > { %p2556_p6 = por %p2555_p5, %p2554_p2 }
  0x4e   : > { %p2550_p1 = pneg %p2549_p0 }
  0x50   : > { %p2557_p3 = pnand %p2556_p6, %p2550_p1 }
  0x52   : > { %2560 = shalt.err (!%p2557_p3)
}
  0x53   : > { %2231 = dma.hbm_to_vmem [thread:$0]  (!%p2751_p9), %s2891_s0, 256, %s241_s16, [#allocation6]  }
  0x54   : > { %p2904_p4 = scmp.ne.s32.totalorder %s2901_s25, 0 }
  0x55   : > { %p2905_p8 = scmp.ne.s32.totalorder (!%p2904_p4), %s2900_s24, 0 }
  0x56   : > { %249 = sbr.rel (%p2904_p4) target bundleno = 938 (0x3aa), region = 40 }
  0x5d   : > { %2600 = dma.done.wait (%p2905_p8), [#allocation6], 256  }
  0x5e   : > { %2602 = vsyncadd (%p2905_p8), [#allocation6], 4294967040 }
  0x5f   : > { %2604 = dma.done.wait (%p2905_p8), [#allocation9], 16384  }
  0x60   : > { %2606 = vsyncadd (%p2905_p8), [#allocation9], 4294950912  ;;  %p2048_p7 = scmp.ne.s32.totalorder %s2613_s18, 0 }
  0x61   : > { %v2283_v0 = vld [vmem:[#allocation8 + $0x4] ss:$16 sps:$4 sm:$0xff] (!%p2048_p7)   ;;  %v2285_v1 = vld [vmem:[#allocation8 + $0xc] ss:$16 sps:$4 sm:$0xff] (!%p2048_p7)   ;;  %v2287_v2 = vld [vmem:[#allocation8] ss:$16 sps:$4 sm:$0xff] (!%p2048_p7)  }
  0x62   : > { %297 = sbr.rel (%p2048_p7) target bundleno = 607 (0x25f), region = 56  ;;  %691 = vmatprep.subr.bf16.mxu0 (!%p2048_p7), %v2283_v0  ;;  %v2288_v3 = vld [vmem:[#allocation8 + $0x8] ss:$16 sps:$4 sm:$0xff] (!%p2048_p7)   ;;  %732 = vmatprep.subr.bf16.mxu1 (!%p2048_p7), %v2285_v1  ;;  %v2289_v4 = vld [vmem:[#allocation8 + $0x24] ss:$16 sps:$4 sm:$0xff] (!%p2048_p7)   ;;  %vm794_vm0 = vcmask (!%p2048_p7), 64512  }
  0x63   : > { %692 = vmatpush1.bf16.msra.mxu0 (!%p2048_p7), %v2287_v2  ;;  %733 = vmatpush1.bf16.msra.mxu1 (!%p2048_p7), %v2288_v3  ;;  %v2291_v5 = vld [vmem:[#allocation8 + $0x2c] ss:$16 sps:$4 sm:$0xff] (!%p2048_p7)   ;;  %v2293_v6 = vld [vmem:[#allocation8 + $0x20] ss:$16 sps:$4 sm:$0xff] (!%p2048_p7)   ;;  %v2294_v7 = vld [vmem:[#allocation8 + $0x28] ss:$16 sps:$4 sm:$0xff] (!%p2048_p7)  }
  0x64   : > { %693 = vmatprep.subr.bf16.mxu0 (!%p2048_p7), %v2289_v4  ;;  %734 = vmatprep.subr.bf16.mxu1 (!%p2048_p7), %v2291_v5  ;;  %v2295_v8 = vld [vmem:[#allocation8 + $0x44] ss:$16 sps:$4 sm:$0xff] (!%p2048_p7)   ;;  %v2297_v9 = vld [vmem:[#allocation8 + $0x4c] ss:$16 sps:$4 sm:$0xff] (!%p2048_p7)   ;;  %v2299_v10 = vld [vmem:[#allocation8 + $0x40] ss:$16 sps:$4 sm:$0xff] (!%p2048_p7)  }
  0x65   : > { %v2300_v11 = vld [vmem:[#allocation8 + $0x48] ss:$16 sps:$4 sm:$0xff] (!%p2048_p7)   ;;  %v2301_v12 = vld [vmem:[#allocation8 + $0x64] ss:$16 sps:$4 sm:$0xff] (!%p2048_p7)   ;;  %v2303_v13 = vld [vmem:[#allocation8 + $0x6c] ss:$16 sps:$4 sm:$0xff] (!%p2048_p7)  }
  0x66   : > { %v2305_v14 = vld [vmem:[#allocation8 + $0x60] ss:$16 sps:$4 sm:$0xff] (!%p2048_p7)   ;;  %v2306_v15 = vld [vmem:[#allocation8 + $0x68] ss:$16 sps:$4 sm:$0xff] (!%p2048_p7)   ;;  %v2307_v16 = vld [vmem:[#allocation8 + $0x84] ss:$16 sps:$4 sm:$0xff] (!%p2048_p7)  }
  0x67   : > { %694 = vmatpush1.bf16.msra.mxu0 (!%p2048_p7), %v2293_v6  ;;  %735 = vmatpush1.bf16.msra.mxu1 (!%p2048_p7), %v2294_v7  ;;  %v2309_v17 = vld [vmem:[#allocation8 + $0x8c] ss:$16 sps:$4 sm:$0xff] (!%p2048_p7)   ;;  %v2311_v18 = vld [vmem:[#allocation8 + $0x80] ss:$16 sps:$4 sm:$0xff] (!%p2048_p7)   ;;  %v2312_v19 = vld [vmem:[#allocation8 + $0x88] ss:$16 sps:$4 sm:$0xff] (!%p2048_p7)  }
  0x68   : > { %695 = vmatprep.subr.bf16.mxu0 (!%p2048_p7), %v2295_v8  ;;  %736 = vmatprep.subr.bf16.mxu1 (!%p2048_p7), %v2297_v9  ;;  %v2313_v20 = vld [vmem:[#allocation8 + $0xa4] ss:$16 sps:$4 sm:$0xff] (!%p2048_p7)   ;;  %v2315_v21 = vld [vmem:[#allocation8 + $0xac] ss:$16 sps:$4 sm:$0xff] (!%p2048_p7)   ;;  %v2317_v22 = vld [vmem:[#allocation8 + $0xa0] ss:$16 sps:$4 sm:$0xff] (!%p2048_p7)  }
  0x69   : > { %v2318_v23 = vld [vmem:[#allocation8 + $0xa8] ss:$16 sps:$4 sm:$0xff]   ;;  %v2319_v24 = vld [vmem:[#allocation8 + $0xc4] ss:$16 sps:$4 sm:$0xff]   ;;  %v2321_v25 = vld [vmem:[#allocation8 + $0xcc] ss:$16 sps:$4 sm:$0xff]  }
  0x6a   : > { %v2323_v26 = vld [vmem:[#allocation8 + $0xc0] ss:$16 sps:$4 sm:$0xff]   ;;  %v2324_v27 = vld [vmem:[#allocation8 + $0xc8] ss:$16 sps:$4 sm:$0xff]   ;;  %v2325_v28 = vld [vmem:[#allocation8 + $0xe4] ss:$16 sps:$4 sm:$0xff]  }
  0x6b   : > { %696 = vmatpush1.bf16.msra.mxu0 %v2299_v10  ;;  %737 = vmatpush1.bf16.msra.mxu1 %v2300_v11  ;;  %v2327_v29 = vld [vmem:[#allocation8 + $0xec] ss:$16 sps:$4 sm:$0xff]   ;;  %v2329_v30 = vld [vmem:[#allocation8 + $0xe0] ss:$16 sps:$4 sm:$0xff]   ;;  %v2330_v31 = vld [vmem:[#allocation8 + $0xe8] ss:$16 sps:$4 sm:$0xff]  }
  0x6c   : > { %697 = vmatprep.subr.bf16.mxu0 %v2301_v12  ;;  %738 = vmatprep.subr.bf16.mxu1 %v2303_v13  ;;  %v2331_v32 = vld [vmem:[#allocation8 + $0x104] ss:$16 sps:$4 sm:$0xff]   ;;  %v2333_v33 = vld [vmem:[#allocation8 + $0x10c] ss:$16 sps:$4 sm:$0xff]   ;;  %v2335_v34 = vld [vmem:[#allocation8 + $0x100] ss:$16 sps:$4 sm:$0xff]  }
  0x6d   : > { %v2336_v35 = vld [vmem:[#allocation8 + $0x108] ss:$16 sps:$4 sm:$0xff]   ;;  %v2337_v36 = vld [vmem:[#allocation8 + $0x124] ss:$16 sps:$4 sm:$0xff]   ;;  %v2339_v37 = vld [vmem:[#allocation8 + $0x12c] ss:$16 sps:$4 sm:$0xff]  }
  0x6e   : > { %v2341_v38 = vld [vmem:[#allocation8 + $0x120] ss:$16 sps:$4 sm:$0xff]   ;;  %v2342_v39 = vld [vmem:[#allocation8 + $0x128] ss:$16 sps:$4 sm:$0xff]   ;;  %v2343_v40 = vld [vmem:[#allocation8 + $0x144] ss:$16 sps:$4 sm:$0xff]  }
  0x6f   : > { %698 = vmatpush1.bf16.msra.mxu0 %v2305_v14  ;;  %739 = vmatpush1.bf16.msra.mxu1 %v2306_v15  ;;  %v2345_v41 = vld [vmem:[#allocation8 + $0x14c] ss:$16 sps:$4 sm:$0xff]   ;;  %v2347_v42 = vld [vmem:[#allocation8 + $0x140] ss:$16 sps:$4 sm:$0xff]   ;;  %v2348_v43 = vld [vmem:[#allocation8 + $0x148] ss:$16 sps:$4 sm:$0xff]  }
  0x70   : > { %699 = vmatprep.subr.bf16.mxu0 %v2307_v16  ;;  %740 = vmatprep.subr.bf16.mxu1 %v2309_v17  ;;  %v2349_v44 = vld [vmem:[#allocation8 + $0x164] ss:$16 sps:$4 sm:$0xff]   ;;  %v2351_v45 = vld [vmem:[#allocation8 + $0x16c] ss:$16 sps:$4 sm:$0xff]   ;;  %v2353_v48 = vld [vmem:[#allocation8 + $0x160] ss:$16 sps:$4 sm:$0xff]  }
  0x71   : > { %v304_v46 = vld [vmem:[#allocation5 + $0x8] sm:$0xff]  ;;  %v2355_v50 = vld [vmem:[#allocation8 + $0x184] ss:$16 sps:$4 sm:$0xff]   ;;  %v2359_v52 = vld [vmem:[#allocation8 + $0x180] ss:$16 sps:$4 sm:$0xff]   ;;  %v2630_v4 = vmov 0.0  }
  0x72   : > { %v306_v47 = vpack.c.bf16 %v304_v46, %v304_v46  ;;  %v2354_v49 = vld [vmem:[#allocation8 + $0x168] ss:$16 sps:$4 sm:$0xff]   ;;  %v2357_v51 = vld [vmem:[#allocation8 + $0x18c] ss:$16 sps:$4 sm:$0xff]   ;;  %v2361_v54 = vld [vmem:[#allocation8 + $0x1a4] ss:$16 sps:$4 sm:$0xff]  }
  0x73   : > { %700 = vmatpush1.bf16.msra.mxu0 %v2311_v18  ;;  %741 = vmatpush1.bf16.msra.mxu1 %v2312_v19  ;;  %v2360_v53 = vld [vmem:[#allocation8 + $0x188] ss:$16 sps:$4 sm:$0xff]   ;;  %v2363_v55 = vld [vmem:[#allocation8 + $0x1ac] ss:$16 sps:$4 sm:$0xff]   ;;  %v2365_v56 = vld [vmem:[#allocation8 + $0x1a0] ss:$16 sps:$4 sm:$0xff]  }
  0x74   : > { %701 = vmatprep.subr.bf16.mxu0 %v2313_v20  ;;  %742 = vmatprep.subr.bf16.mxu1 %v2315_v21  ;;  %v2366_v57 = vld [vmem:[#allocation8 + $0x1a8] ss:$16 sps:$4 sm:$0xff]   ;;  %v2367_v58 = vld [vmem:[#allocation8 + $0x1c4] ss:$16 sps:$4 sm:$0xff]   ;;  %v2369_v59 = vld [vmem:[#allocation8 + $0x1cc] ss:$16 sps:$4 sm:$0xff]  }
  0x75   : > { %723 = vmatprep.mubr.bf16.mxu0 %v306_v47  ;;  %764 = vmatprep.mubr.bf16.mxu1 %v306_v47  ;;  %v2371_v60 = vld [vmem:[#allocation8 + $0x1c0] ss:$16 sps:$4 sm:$0xff]   ;;  %v2372_v61 = vld [vmem:[#allocation8 + $0x1c8] ss:$16 sps:$4 sm:$0xff]   ;;  %v2373_v62 = vld [vmem:[#allocation8 + $0x1e4] ss:$16 sps:$4 sm:$0xff]  }
  0x76   : > { %v2375_v63 = vld [vmem:[#allocation8 + $0x1ec] ss:$16 sps:$4 sm:$0xff]   ;;  %v2377_v0 = vld [vmem:[#allocation8 + $0x1e0] ss:$16 sps:$4 sm:$0xff]   ;;  %v2378_v1 = vld [vmem:[#allocation8 + $0x1e8] ss:$16 sps:$4 sm:$0xff]  }
  0x77   : > { %702 = vmatpush1.bf16.msra.mxu0 %v2317_v22  ;;  %743 = vmatpush1.bf16.msra.mxu1 %v2318_v23  ;;  %v303_v2 = vld [vmem:[#allocation5] sm:$0xff]  ;;  %302 = vst [vmem:[#allocation3] sm:$0xff] %v2630_v4  ;;  %v2631_v19 = vmov 1.0   ;;  %v2632_v20 = vmov 1966171168   ;;  %v1096_v22 = vlaneseq }
  0x78   : > { %703 = vmatprep.subr.bf16.mxu0 %v2319_v24  ;;  %744 = vmatprep.subr.bf16.mxu1 %v2321_v25  ;;  %v305_v3 = vpack.c.bf16 %v303_v2, %v303_v2  ;;  %v1094_v21 = vunpack.c.l.s4 %v2632_v20 }
  0x79   : > { %v1097_v24 = vshrl.u32 %v1096_v22, 7  ;;  %vm1119_vm1 = vcmp.lt.s32.totalorder %v1096_v22, 512 }
  0x7a   : > { %v1095_v23 = vunpack.c.0.s8 %v1094_v21 }
  0x7b   : > { %704 = vmatpush1.bf16.msra.mxu0 %v2323_v26  ;;  %745 = vmatpush1.bf16.msra.mxu1 %v2324_v27 }
  0x7c   : > { %705 = vmatprep.subr.bf16.mxu0 %v2325_v28  ;;  %746 = vmatprep.subr.bf16.mxu1 %v2327_v29  ;;  %v1098_v26 = vsub.s32 %v1095_v23, %v1097_v24 }
  0x7e   : > { %v1123_v47 = vld [vmem:[#allocation3 + $0x1] ss:$2 sm:$0xf] }
  0x7f   : > { %706 = vmatpush1.bf16.msra.mxu0 %v2329_v30  ;;  %747 = vmatpush1.bf16.msra.mxu1 %v2330_v31 }
  0x80   : > { %707 = vmatprep.subr.bf16.mxu0 %v2331_v32  ;;  %748 = vmatprep.subr.bf16.mxu1 %v2333_v33 }
  0x83   : > { %708 = vmatpush1.bf16.msra.mxu0 %v2335_v34  ;;  %749 = vmatpush1.bf16.msra.mxu1 %v2336_v35 }
  0x84   : > { %709 = vmatprep.subr.bf16.mxu0 %v2337_v36  ;;  %750 = vmatprep.subr.bf16.mxu1 %v2339_v37 }
  0x87   : > { %710 = vmatpush1.bf16.msra.mxu0 %v2341_v38  ;;  %751 = vmatpush1.bf16.msra.mxu1 %v2342_v39 }
  0x88   : > { %711 = vmatprep.subr.bf16.mxu0 %v2343_v40  ;;  %752 = vmatprep.subr.bf16.mxu1 %v2345_v41  ;;  %v1086_v41 = vld [vmem:[#allocation3] ss:$2 sm:$0xf] }
  0x8b   : > { %712 = vmatpush1.bf16.msra.mxu0 %v2347_v42  ;;  %753 = vmatpush1.bf16.msra.mxu1 %v2348_v43 }
  0x8c   : > { %713 = vmatprep.subr.bf16.mxu0 %v2349_v44  ;;  %754 = vmatprep.subr.bf16.mxu1 %v2351_v45 }
  0x8f   : > { %714 = vmatpush1.bf16.msra.mxu0 %v2353_v48  ;;  %755 = vmatpush1.bf16.msra.mxu1 %v2354_v49 }
  0x90   : > { %715 = vmatprep.subr.bf16.mxu0 %v2355_v50  ;;  %756 = vmatprep.subr.bf16.mxu1 %v2357_v51 }
  0x93   : > { %716 = vmatpush1.bf16.msra.mxu0 %v2359_v52  ;;  %757 = vmatpush1.bf16.msra.mxu1 %v2360_v53 }
  0x94   : > { %717 = vmatprep.subr.bf16.mxu0 %v2361_v54  ;;  %758 = vmatprep.subr.bf16.mxu1 %v2363_v55 }
  0x97   : > { %718 = vmatpush1.bf16.msra.mxu0 %v2365_v56  ;;  %759 = vmatpush1.bf16.msra.mxu1 %v2366_v57 }
  0x98   : > { %719 = vmatprep.subr.bf16.mxu0 %v2367_v58  ;;  %760 = vmatprep.subr.bf16.mxu1 %v2369_v59 }
  0x9b   : > { %720 = vmatpush1.bf16.msra.mxu0 %v2371_v60  ;;  %761 = vmatpush1.bf16.msra.mxu1 %v2372_v61 }
  0x9c   : > { %721 = vmatprep.subr.bf16.mxu0 %v2373_v62  ;;  %762 = vmatprep.subr.bf16.mxu1 %v2375_v63 }
  0x9f   : > { %722 = vmatpush1.bf16.msra.mxu0 %v2377_v0  ;;  %763 = vmatpush1.bf16.msra.mxu1 %v2378_v1 }
  0xa2   : > { %724 = vmatmul.mubr.bf16.vlgmr.msra.gmra.mrb[0].mxu0 %v305_v3  ;;  %765 = vmatmul.mubr.bf16.vlgmr.msra.gmra.mrb[0].mxu1 %v305_v3 }
  0xa3   : > { %862 = vmatprep.mubr.f32.mxu0 %v2630_v4  ;;  %933 = vmatprep.mubr.f32.mxu1 %v2630_v4 }
 0x175   : > { %v725_v5 = vpop.f32.mrb[0].mxu0  ;;  %v766_v6 = vpop.f32.mrb[0].mxu1 }
 0x176   : > { %v727_v7 = vpop.f32.mrb[1].mxu0  ;;  %v768_v8 = vpop.f32.mrb[1].mxu1  ;;  %v940_v17 = vmul.f32 %v725_v5, %v725_v5  ;;  %v942_v18 = vmul.f32 %v766_v6, %v766_v6 }
 0x177   : > { %v2201_v9 = vpack.c.bf16 %v727_v7, %v725_v5  ;;  %v941_v10 = vmul.f32 %v727_v7, %v727_v7  ;;  %v2202_v11 = vpack.c.bf16 %v768_v8, %v766_v6  ;;  %v943_v12 = vmul.f32 %v768_v8, %v768_v8  ;;  %v729_v13 = vpop.f32.mrb[2].mxu0  ;;  %v770_v14 = vpop.f32.mrb[2].mxu1  ;;  %798 = vmatprep.subr.mxu0 %v727_v7 }
 0x178   : > { %869 = vmatprep.subr.mxu1 %v768_v8  ;;  %v730_v15 = vpop.f32.mrb[3].mxu0  ;;  %v771_v16 = vpop.f32.mrb[3].mxu1  ;;  %799 = vmatpush1.msra.mxu0 %v725_v5 }
 0x179   : > { %792 = vst [vmem:[#allocation2] sm:$0xff] %v2201_v9  ;;  %793 = vst [vmem:[#allocation2 + $0x8] sm:$0xff] %v2202_v11  ;;  %870 = vmatpush1.msra.mxu1 %v766_v6  ;;  %944 = vmatprep.subr.mxu0 %v941_v10 }
 0x17a   : > { %1015 = vmatprep.subr.mxu1 %v943_v12  ;;  %2115 = vmatmul.mubr.msk.f32.vlgmr.msra.gmra.mrb[4].mxu0 %vm794_vm0, %v2631_v19 }
 0x17b   : > { %2116 = vmatmul.mubr.msk.f32.vlgmr.msra.gmra.mrb[4].mxu1 %vm794_vm0, %v2631_v19  ;;  %945 = vmatpush1.msra.mxu0 %v940_v17 }
 0x17c   : > { %1016 = vmatpush1.msra.mxu1 %v942_v18  ;;  %1008 = vmatprep.mubr.f32.mxu0 %v2630_v4 }
 0x17d   : > { %1079 = vmatprep.mubr.f32.mxu1 %v2630_v4 }
 0x17e   : > { %2117 = vmatmul.mubr.msk.f32.vlgmr.msra.gmra.mrb[6].mxu0 %vm794_vm0, %v2631_v19 }
 0x17f   : > { %2118 = vmatmul.mubr.msk.f32.vlgmr.msra.gmra.mrb[6].mxu1 %vm794_vm0, %v2631_v19 }
 0x24d   : > { %v864_v25 = vpop.f32.mrb[4].mxu0 }
 0x24e   : > { %v935_v27 = vpop.f32.mrb[4].mxu1  ;;  %v866_v28 = vpop.f32.mrb[5].mxu0 }
 0x24f   : > { %v1091_v29 = vcombine.low %v864_v25, %v866_v28  ;;  %v937_v30 = vpop.f32.mrb[5].mxu1 }
 0x250   : > { %v1092_v31 = vcombine.low %v935_v27, %v937_v30 }
 0x251   : > { %v1099_v32 = vrot.slane %v1091_v29, %v1098_v26  ;;  %v1010_v33 = vpop.f32.mrb[6].mxu0 }
 0x252   : > { %v1106_v34 = vrot.slane %v1092_v31, %v1098_v26  ;;  %v1081_v35 = vpop.f32.mrb[6].mxu1  ;;  %v1012_v36 = vpop.f32.mrb[7].mxu0 }
 0x253   : > { %v1128_v37 = vcombine.low %v1010_v33, %v1012_v36  ;;  %v1083_v38 = vpop.f32.mrb[7].mxu1 }
 0x254   : > { %v1107_v39 = vcombine.low %v1099_v32, %v1106_v34  ;;  %v1129_v40 = vcombine.low %v1081_v35, %v1083_v38 }
 0x255   : > { %v1136_v42 = vrot.slane %v1128_v37, %v1098_v26 }
 0x256   : > { %v1114_v43 = vrot.slane %v1107_v39, %v1098_v26  ;;  %v1143_v44 = vrot.slane %v1129_v40, %v1098_v26 }
 0x258   : > { %v1116_v45 = vadd.f32 %v1114_v43, %v1086_v41  ;;  %v1144_v46 = vcombine.low %v1136_v42, %v1143_v44 }
 0x25a   : > { %1121 = vst.msk [vmem:[#allocation3] ss:$2 sm:$0xf] %vm1119_vm1, %v1116_v45  ;;  %v1151_v48 = vrot.slane %v1144_v46, %v1098_v26 }
 0x25c   : > { %v1153_v49 = vadd.f32 %v1151_v48, %v1123_v47 }
 0x25e   : > { %1154 = vst.msk [vmem:[#allocation3 + $0x1] ss:$2 sm:$0xf] %vm1119_vm1, %v1153_v49 }
 0x25f PF: > { %p2119_p9 = scmp.ne.s32.totalorder %s2613_s18, 1 }
 0x260   : > { %v2379_v50 = vld [vmem:[#allocation10 + $0x4] ss:$8 sps:$4 sm:$0xff] (!%p2119_p9)   ;;  %v2381_v51 = vld [vmem:[#allocation10] ss:$8 sps:$4 sm:$0xff] (!%p2119_p9)   ;;  %v2385_v54 = vld [vmem:[#allocation10 + $0x14] ss:$8 sps:$4 sm:$0xff] (!%p2119_p9)  }
 0x261   : > { %1158 = sbr.rel (%p2119_p9) target bundleno = 915 (0x393), region = 64  ;;  %1836 = vmatprep.subr.bf16.mxu1 (!%p2119_p9), %v2379_v50  ;;  %v2382_v52 = vld [vmem:[#allocation10 + $0x104] ss:$8 sps:$4 sm:$0xff] (!%p2119_p9)   ;;  %v2384_v53 = vld [vmem:[#allocation10 + $0x100] ss:$8 sps:$4 sm:$0xff] (!%p2119_p9)   ;;  %vm1232_vm2 = vcmask (!%p2119_p9), 1040384  }
 0x262   : > { %1837 = vmatpush1.bf16.msra.mxu1 (!%p2119_p9), %v2381_v51  ;;  %v2387_v55 = vld [vmem:[#allocation10 + $0x10] ss:$8 sps:$4 sm:$0xff] (!%p2119_p9)   ;;  %1877 = vmatprep.subr.bf16.mxu0 (!%p2119_p9), %v2382_v52  ;;  %v2388_v56 = vld [vmem:[#allocation10 + $0x114] ss:$8 sps:$4 sm:$0xff] (!%p2119_p9)   ;;  %v2391_v58 = vld [vmem:[#allocation10 + $0x24] ss:$8 sps:$4 sm:$0xff] (!%p2119_p9)   ;;  %v1179_v52 = vlaneseq (!%p2119_p9) }
 0x263   : > { %1878 = vmatpush1.bf16.msra.mxu0 (!%p2119_p9), %v2384_v53  ;;  %1838 = vmatprep.subr.bf16.mxu1 (!%p2119_p9), %v2385_v54  ;;  %v2390_v57 = vld [vmem:[#allocation10 + $0x110] ss:$8 sps:$4 sm:$0xff] (!%p2119_p9)   ;;  %v2393_v59 = vld [vmem:[#allocation10 + $0x20] ss:$8 sps:$4 sm:$0xff] (!%p2119_p9)   ;;  %v2394_v60 = vld [vmem:[#allocation10 + $0x124] ss:$8 sps:$4 sm:$0xff] (!%p2119_p9)  }
 0x264   : > { %1879 = vmatprep.subr.bf16.mxu0 (!%p2119_p9), %v2388_v56  ;;  %v2397_v61 = vld [vmem:[#allocation10 + $0x34] ss:$8 sps:$4 sm:$0xff] (!%p2119_p9)   ;;  %v2396_v62 = vld [vmem:[#allocation10 + $0x120] ss:$8 sps:$4 sm:$0xff] (!%p2119_p9)   ;;  %v2399_v0 = vld [vmem:[#allocation10 + $0x30] ss:$8 sps:$4 sm:$0xff] (!%p2119_p9)  }
 0x265   : > { %v2400_v63 = vld [vmem:[#allocation10 + $0x134] ss:$8 sps:$4 sm:$0xff] (!%p2119_p9)   ;;  %v2403_v1 = vld [vmem:[#allocation10 + $0x44] ss:$8 sps:$4 sm:$0xff] (!%p2119_p9)   ;;  %v2402_v2 = vld [vmem:[#allocation10 + $0x130] ss:$8 sps:$4 sm:$0xff] (!%p2119_p9)  }
 0x266   : > { %1839 = vmatpush1.bf16.msra.mxu1 (!%p2119_p9), %v2387_v55  ;;  %v2406_v3 = vld [vmem:[#allocation10 + $0x144] ss:$8 sps:$4 sm:$0xff] (!%p2119_p9)   ;;  %v2405_v4 = vld [vmem:[#allocation10 + $0x40] ss:$8 sps:$4 sm:$0xff] (!%p2119_p9)   ;;  %v2409_v5 = vld [vmem:[#allocation10 + $0x54] ss:$8 sps:$4 sm:$0xff] (!%p2119_p9)  }
 0x267   : > { %1840 = vmatprep.subr.bf16.mxu1 (!%p2119_p9), %v2391_v58  ;;  %1880 = vmatpush1.bf16.msra.mxu0 (!%p2119_p9), %v2390_v57  ;;  %v2408_v6 = vld [vmem:[#allocation10 + $0x140] ss:$8 sps:$4 sm:$0xff] (!%p2119_p9)   ;;  %v2412_v7 = vld [vmem:[#allocation10 + $0x154] ss:$8 sps:$4 sm:$0xff] (!%p2119_p9)   ;;  %v2411_v8 = vld [vmem:[#allocation10 + $0x50] ss:$8 sps:$4 sm:$0xff] (!%p2119_p9)  }
 0x268   : > { %1881 = vmatprep.subr.bf16.mxu0 %v2394_v60  ;;  %v2415_v9 = vld [vmem:[#allocation10 + $0x64] ss:$8 sps:$4 sm:$0xff]   ;;  %v2414_v10 = vld [vmem:[#allocation10 + $0x150] ss:$8 sps:$4 sm:$0xff]   ;;  %v2417_v12 = vld [vmem:[#allocation10 + $0x60] ss:$8 sps:$4 sm:$0xff]  }
 0x269   : > { %v2418_v11 = vld [vmem:[#allocation10 + $0x164] ss:$8 sps:$4 sm:$0xff]   ;;  %v2421_v13 = vld [vmem:[#allocation10 + $0x74] ss:$8 sps:$4 sm:$0xff]   ;;  %v2420_v14 = vld [vmem:[#allocation10 + $0x160] ss:$8 sps:$4 sm:$0xff]  }
 0x26a   : > { %1841 = vmatpush1.bf16.msra.mxu1 %v2393_v59  ;;  %v2424_v15 = vld [vmem:[#allocation10 + $0x174] ss:$8 sps:$4 sm:$0xff]   ;;  %v2423_v16 = vld [vmem:[#allocation10 + $0x70] ss:$8 sps:$4 sm:$0xff]   ;;  %v2427_v17 = vld [vmem:[#allocation10 + $0x84] ss:$8 sps:$4 sm:$0xff]  }
 0x26b   : > { %1842 = vmatprep.subr.bf16.mxu1 %v2397_v61  ;;  %1882 = vmatpush1.bf16.msra.mxu0 %v2396_v62  ;;  %v2426_v18 = vld [vmem:[#allocation10 + $0x170] ss:$8 sps:$4 sm:$0xff]   ;;  %v2430_v19 = vld [vmem:[#allocation10 + $0x184] ss:$8 sps:$4 sm:$0xff]   ;;  %v2429_v20 = vld [vmem:[#allocation10 + $0x80] ss:$8 sps:$4 sm:$0xff]  }
 0x26c   : > { %1883 = vmatprep.subr.bf16.mxu0 %v2400_v63  ;;  %v2433_v21 = vld [vmem:[#allocation10 + $0x94] ss:$8 sps:$4 sm:$0xff]   ;;  %v2432_v22 = vld [vmem:[#allocation10 + $0x180] ss:$8 sps:$4 sm:$0xff]   ;;  %v2435_v24 = vld [vmem:[#allocation10 + $0x90] ss:$8 sps:$4 sm:$0xff]  }
 0x26d   : > { %v2436_v23 = vld [vmem:[#allocation10 + $0x194] ss:$8 sps:$4 sm:$0xff]   ;;  %v2439_v25 = vld [vmem:[#allocation10 + $0xa4] ss:$8 sps:$4 sm:$0xff]   ;;  %v2438_v26 = vld [vmem:[#allocation10 + $0x190] ss:$8 sps:$4 sm:$0xff]  }
 0x26e   : > { %1843 = vmatpush1.bf16.msra.mxu1 %v2399_v0  ;;  %v2442_v27 = vld [vmem:[#allocation10 + $0x1a4] ss:$8 sps:$4 sm:$0xff]   ;;  %v2441_v28 = vld [vmem:[#allocation10 + $0xa0] ss:$8 sps:$4 sm:$0xff]   ;;  %v2445_v29 = vld [vmem:[#allocation10 + $0xb4] ss:$8 sps:$4 sm:$0xff]  }
 0x26f   : > { %1844 = vmatprep.subr.bf16.mxu1 %v2403_v1  ;;  %1884 = vmatpush1.bf16.msra.mxu0 %v2402_v2  ;;  %v2444_v30 = vld [vmem:[#allocation10 + $0x1a0] ss:$8 sps:$4 sm:$0xff]   ;;  %v2448_v31 = vld [vmem:[#allocation10 + $0x1b4] ss:$8 sps:$4 sm:$0xff]   ;;  %v2447_v33 = vld [vmem:[#allocation10 + $0xb0] ss:$8 sps:$4 sm:$0xff]  }
 0x270   : > { %1885 = vmatprep.subr.bf16.mxu0 %v2406_v3  ;;  %v1163_v32 = vld [vmem:[#allocation3] ss:$2 sm:$0xf]  ;;  %v1166_v35 = vld [vmem:[#allocation3 + $0x1] ss:$2 sm:$0xf] }
 0x271   : > { %v2787_v34 = vmul.f32 0.5, %v1163_v32  ;;  %v2451_v36 = vld [vmem:[#allocation10 + $0xc4] ss:$8 sps:$4 sm:$0xff]   ;;  %v1167_v37 = vmul.f32 0.5, %v1166_v35  ;;  %v2450_v38 = vld [vmem:[#allocation10 + $0x1b0] ss:$8 sps:$4 sm:$0xff]  }
 0x272   : > { %1845 = vmatpush1.bf16.msra.mxu1 %v2405_v4  ;;  %v2454_v40 = vld [vmem:[#allocation10 + $0x1c4] ss:$8 sps:$4 sm:$0xff]   ;;  %v2453_v41 = vld [vmem:[#allocation10 + $0xc0] ss:$8 sps:$4 sm:$0xff]   ;;  %v2457_v43 = vld [vmem:[#allocation10 + $0xd4] ss:$8 sps:$4 sm:$0xff]  }
 0x273   : > { %1846 = vmatprep.subr.bf16.mxu1 %v2409_v5  ;;  %1886 = vmatpush1.bf16.msra.mxu0 %v2408_v6  ;;  %v1168_v39 = vmul.f32 %v2787_v34, %v2787_v34  ;;  %v2456_v44 = vld [vmem:[#allocation10 + $0x1c0] ss:$8 sps:$4 sm:$0xff]   ;;  %v2460_v46 = vld [vmem:[#allocation10 + $0x1d4] ss:$8 sps:$4 sm:$0xff]   ;;  %v2459_v47 = vld [vmem:[#allocation10 + $0xd0] ss:$8 sps:$4 sm:$0xff]  }
 0x274   : > { %1887 = vmatprep.subr.bf16.mxu0 %v2412_v7  ;;  %v2463_v49 = vld [vmem:[#allocation10 + $0xe4] ss:$8 sps:$4 sm:$0xff]   ;;  %v2462_v50 = vld [vmem:[#allocation10 + $0x1d0] ss:$8 sps:$4 sm:$0xff]   ;;  %v2465_v53 = vld [vmem:[#allocation10 + $0xe0] ss:$8 sps:$4 sm:$0xff]  }
 0x275   : > { %v1169_v42 = vsub.f32 %v1167_v37, %v1168_v39  ;;  %v2466_v51 = vld [vmem:[#allocation10 + $0x1e4] ss:$8 sps:$4 sm:$0xff]   ;;  %v2469_v54 = vld [vmem:[#allocation10 + $0xf4] ss:$8 sps:$4 sm:$0xff]   ;;  %v2468_v55 = vld [vmem:[#allocation10 + $0x1e0] ss:$8 sps:$4 sm:$0xff]  }
 0x276   : > { %1847 = vmatpush1.bf16.msra.mxu1 %v2411_v8  ;;  %v2633_v56 = vmov 1966171168   ;;  %v2472_v58 = vld [vmem:[#allocation10 + $0x1f4] ss:$8 sps:$4 sm:$0xff]   ;;  %v1180_v59 = vshrl.u32 %v1179_v52, 7  ;;  %vm1235_vm4 = vcmask 1041409  }
 0x277   : > { %1848 = vmatprep.subr.bf16.mxu1 %v2415_v9  ;;  %1888 = vmatpush1.bf16.msra.mxu0 %v2414_v10  ;;  %v1170_v45 = vmax.f32 %v1169_v42, 0.0  ;;  %v1210_v57 = vunpack.c.l.s4 %v2633_v56  ;;  %vm1233_vm3 = vsmask.f32 256  ;;  %v2471_v60 = vld [vmem:[#allocation10 + $0xf0] ss:$8 sps:$4 sm:$0xff]   ;;  %vm1239_vm8 = vcmask 1042434  }
 0x278   : > { %1889 = vmatprep.subr.bf16.mxu0 %v2418_v11  ;;  %vm1236_vm5 = vsmask.f32 1280  ;;  %v1171_v61 = vld [vmem:[%s2893_s2] sm:$0xf]  ;;  %vm2795_vm6 = vmand %vm1232_vm2, %vm1233_vm3  ;;  %v2474_v0 = vld [vmem:[#allocation10 + $0x1f0] ss:$8 sps:$4 sm:$0xff]  }
 0x279   : > { %v1172_v48 = vadd.f32 1e-05, %v1170_v45  ;;  %v1211_v62 = vunpack.c.0.s8 %v1210_v57  ;;  %v2799_v1 = vsub.s32 0, %v1180_v59  ;;  %v1185_v2 = vsub.s32 1, %v1180_v59  ;;  %vm2802_vm7 = vmand %vm1235_vm4, %vm1236_vm5  ;;  %v1175_v8 = vld [vmem:[%s2894_s3] sm:$0xf] }
 0x27a   : > { %1849 = vmatpush1.bf16.msra.mxu1 %v2417_v12  ;;  %v1189_v3 = vsub.s32 2, %v1180_v59  ;;  %v1193_v6 = vsub.s32 3, %v1180_v59  ;;  %vm1240_vm9 = vsmask.f32 2304  ;;  %vm1238_vm10 = vmor %vm2802_vm7, %vm2795_vm6  ;;  %vm1243_vm12 = vcmask 1043459  }
 0x27b   : > { %1850 = vmatprep.subr.bf16.mxu1 %v2421_v13  ;;  %1890 = vmatpush1.bf16.msra.mxu0 %v2420_v14  ;;  %2475 = vrsqrt.f32 %v1172_v48  ;;  %v1214_v9 = vsub.s32 %v1211_v62, %v1180_v59  ;;  %vm1241_vm11 = vmand %vm1239_vm8, %vm1240_vm9  ;;  %vm1244_vm13 = vsmask.f32 3328  ;;  %vm1307_vm14 = vsmask.f32 7938 }
 0x27c   : > { %1891 = vmatprep.subr.bf16.mxu0 %v2424_v15  ;;  %vm2816_vm15 = vmor %vm1241_vm11, %vm1238_vm10  ;;  %vm1309_vm0 = vsmask.f32 7942  ;;  %vm1312_vm6 = vsmask.f32 7946  ;;  %vm1315_vm9 = vsmask.f32 7950 }
 0x27d   : > { %vm2821_vm1 = vmand %vm1243_vm12, %vm1244_vm13 }
 0x27e   : > { %1851 = vmatpush1.bf16.msra.mxu1 %v2423_v16  ;;  %vm2827_vm3 = vmand %vm1232_vm2, %vm1307_vm14 }
 0x27f   : > { %1852 = vmatprep.subr.bf16.mxu1 %v2427_v17  ;;  %1892 = vmatpush1.bf16.msra.mxu0 %v2426_v18  ;;  %vm2832_vm5 = vmand %vm1235_vm4, %vm1309_vm0 }
 0x280   : > { %1893 = vmatprep.subr.bf16.mxu0 %v2430_v19  ;;  %vm1246_vm7 = vmor %vm2821_vm1, %vm2816_vm15 }
 0x281   : > { %vm1311_vm2 = vmor %vm2832_vm5, %vm2827_vm3 }
 0x282   : > { %1853 = vmatpush1.bf16.msra.mxu1 %v2429_v20  ;;  %vm1313_vm4 = vmand %vm1239_vm8, %vm1312_vm6 }
 0x283   : > { %1854 = vmatprep.subr.bf16.mxu1 %v2433_v21  ;;  %1894 = vmatpush1.bf16.msra.mxu0 %v2432_v22  ;;  %vm1314_vm10 = vmor %vm1313_vm4, %vm1311_vm2 }
 0x284   : > { %1895 = vmatprep.subr.bf16.mxu0 %v2436_v23  ;;  %vm1316_vm11 = vmand %vm1243_vm12, %vm1315_vm9 }
 0x285   : > { %v2476_v5 = vpop.eup %2475  ;;  %vm1317_vm13 = vmor %vm1316_vm11, %vm1314_vm10 }
 0x286   : > { %1855 = vmatpush1.bf16.msra.mxu1 %v2435_v24  ;;  %v1174_v7 = vmul.f32 %v2476_v5, %v1171_v61 }
 0x287   : > { %1856 = vmatprep.subr.bf16.mxu1 %v2439_v25  ;;  %1896 = vmatpush1.bf16.msra.mxu0 %v2438_v26 }
 0x288   : > { %1897 = vmatprep.subr.bf16.mxu0 %v2442_v27  ;;  %v1176_v10 = vmul.f32 %v1174_v7, %v2787_v34  ;;  %v1182_v11 = vrot.slane %v1174_v7, %v2799_v1  ;;  %v1186_v12 = vrot.slane %v1174_v7, %v1185_v2  ;;  %v1190_v13 = vrot.slane %v1174_v7, %v1189_v3 }
 0x289   : > { %v1194_v14 = vrot.slane %v1174_v7, %v1193_v6  ;;  %v1325_v7 = vld [vmem:[#allocation2 + $0x8] sm:$0xff] }
 0x28a   : > { %1857 = vmatpush1.bf16.msra.mxu1 %v2441_v28  ;;  %v1177_v15 = vsub.f32 %v1175_v8, %v1176_v10  ;;  %v2120_v16 = vpack.c.bf16 %v1186_v12, %v1182_v11 }
 0x28b   : > { %1858 = vmatprep.subr.bf16.mxu1 %v2445_v29  ;;  %1898 = vmatpush1.bf16.msra.mxu0 %v2444_v30  ;;  %v2121_v17 = vpack.c.bf16 %v1194_v14, %v1190_v13  ;;  %v2634_v13 = vmov 0  }
 0x28c   : > { %1899 = vmatprep.subr.bf16.mxu0 %v2448_v31  ;;  %v1215_v19 = vrot.slane %v2120_v16, %v1214_v9  ;;  %v1254_v21 = vrot.slane %v1177_v15, %v2799_v1  ;;  %v1258_v22 = vrot.slane %v1177_v15, %v1185_v2  ;;  %v1262_v23 = vrot.slane %v1177_v15, %v1189_v3  ;;  %v1247_v31 = vld [vmem:[#allocation4] sm:$0xf] }
 0x28d   : > { %v1222_v24 = vrot.slane %v2121_v17, %v1214_v9  ;;  %v1266_v25 = vrot.slane %v1177_v15, %v1193_v6 }
 0x28e   : > { %1859 = vmatpush1.bf16.msra.mxu1 %v2447_v33  ;;  %v2122_v27 = vpack.c.bf16 %v1258_v22, %v1254_v21 }
 0x28f   : > { %1860 = vmatprep.subr.bf16.mxu1 %v2451_v36  ;;  %1900 = vmatpush1.bf16.msra.mxu0 %v2450_v38  ;;  %v1223_v29 = vcombine.low %v1215_v19, %v1222_v24  ;;  %v2123_v30 = vpack.c.bf16 %v1266_v25, %v1262_v23 }
 0x290   : > { %1901 = vmatprep.subr.bf16.mxu0 %v2454_v40  ;;  %v1287_v32 = vrot.slane %v2122_v27, %v1214_v9 }
 0x291   : > { %v1230_v33 = vrot.slane %v1223_v29, %v1214_v9  ;;  %v1294_v34 = vrot.slane %v2123_v30, %v1214_v9 }
 0x292   : > { %1861 = vmatpush1.bf16.msra.mxu1 %v2453_v41 }
 0x293   : > { %1862 = vmatprep.subr.bf16.mxu1 %v2457_v43  ;;  %1902 = vmatpush1.bf16.msra.mxu0 %v2456_v44  ;;  %v1248_v35 = vsel %vm1246_vm7, %v1230_v33, %v1247_v31  ;;  %v1295_v36 = vcombine.low %v1287_v32, %v1294_v34 }
 0x294   : > { %1903 = vmatprep.subr.bf16.mxu0 %v2460_v46  ;;  %1249 = vst [vmem:[#allocation4] sm:$0xf] %v1248_v35 }
 0x295   : > { %v1302_v37 = vrot.slane %v1295_v36, %v1214_v9 }
 0x296   : > { %1863 = vmatpush1.bf16.msra.mxu1 %v2459_v47 }
 0x297   : > { %1864 = vmatprep.subr.bf16.mxu1 %v2463_v49  ;;  %1904 = vmatpush1.bf16.msra.mxu0 %v2462_v50  ;;  %v1304_v38 = vshll.u32 %v1302_v37, 16 }
 0x298   : > { %1905 = vmatprep.subr.bf16.mxu0 %v2466_v51 }
 0x29a   : > { %1865 = vmatpush1.bf16.msra.mxu1 %v2465_v53 }
 0x29b   : > { %1866 = vmatprep.subr.bf16.mxu1 %v2469_v54  ;;  %1906 = vmatpush1.bf16.msra.mxu0 %v2468_v55  ;;  %v1318_v39 = vld [vmem:[#allocation4] sm:$0xf] }
 0x29c   : > { %1907 = vmatprep.subr.bf16.mxu0 %v2472_v58  ;;  %v1319_v40 = vsel %vm1317_vm13, %v1304_v38, %v1318_v39  ;;  %v1324_v58 = vld [vmem:[#allocation2] sm:$0xff] }
 0x29d   : > { %1320 = vst [vmem:[#allocation4] sm:$0xf] %v1319_v40 }
 0x29e   : > { %1867 = vmatpush1.bf16.msra.mxu1 %v2471_v60 }
 0x29f   : > { %1908 = vmatpush1.bf16.msra.mxu0 %v2474_v0 }
 0x2a4   : > { %v2124_v41 = vld.sshfl [vmem:[#allocation4] sm:$0x33 pattern:$0x75316420] }
 0x2a5   : > { %v1335_v42 = vcombine.high %v2124_v41, %v2124_v41  ;;  %v1342_v43 = vrot.slane %v2124_v41, %v1214_v9 }
 0x2a7   : > { %v1349_v44 = vrot.slane %v1335_v42, %v1214_v9  ;;  %v1353_v45 = vpack.i.b16 %v1342_v43, %v1342_v43  ;;  %v1394_v46 = vshrl.u32 %v1342_v43, 16  ;;  %v1350_v47 = vcombine.high %v1342_v43, %v1342_v43 }
 0x2a9   : > { %v1358_v48 = vrot.slane %v1353_v45, %v2799_v1  ;;  %v1360_v49 = vpack.i.b16 %v1349_v44, %v1349_v44  ;;  %v1395_v50 = vpack.i.b16 %v1394_v46, %v1394_v46  ;;  %v1401_v51 = vshrl.u32 %v1349_v44, 16 }
 0x2aa   : > { %v1351_v52 = vcombine.high %v1349_v44, %v1349_v44  ;;  %v1367_v53 = vpack.i.b16 %v1350_v47, %v1350_v47  ;;  %v1408_v54 = vshrl.u32 %v1350_v47, 16 }
 0x2ab   : > { %v1365_v55 = vrot.slane %v1360_v49, %v2799_v1  ;;  %v1400_v56 = vrot.slane %v1395_v50, %v2799_v1  ;;  %v1402_v57 = vpack.i.b16 %v1401_v51, %v1401_v51 }
 0x2ac   : > { %v1372_v59 = vrot.slane %v1367_v53, %v2799_v1  ;;  %v1374_v60 = vpack.i.b16 %v1351_v52, %v1351_v52  ;;  %v1409_v61 = vpack.i.b16 %v1408_v54, %v1408_v54  ;;  %v1415_v62 = vshrl.u32 %v1351_v52, 16 }
 0x2ad   : > { %v2125_v63 = vcombine.low %v1358_v48, %v1365_v55  ;;  %v1407_v0 = vrot.slane %v1402_v57, %v2799_v1 }
 0x2ae   : > { %v1379_v2 = vrot.slane %v1374_v60, %v2799_v1  ;;  %v1414_v3 = vrot.slane %v1409_v61, %v2799_v1  ;;  %v1416_v4 = vpack.i.b16 %v1415_v62, %v1415_v62 }
 0x2af   : > { %v1392_v5 = vmul.bf16 %v2125_v63, %v1324_v58  ;;  %v2127_v6 = vcombine.low %v1400_v56, %v1407_v0 }
 0x2b0   : > { %v2126_v8 = vcombine.low %v1372_v59, %v1379_v2  ;;  %v1421_v9 = vrot.slane %v1416_v4, %v2799_v1 }
 0x2b1   : > { %v1434_v10 = vadd.bf16 %v2127_v6, %v1392_v5 }
 0x2b2   : > { %v1393_v11 = vmul.bf16 %v2126_v8, %v1325_v7  ;;  %v2128_v12 = vcombine.low %v1414_v3, %v1421_v9 }
 0x2b3   : > { %v1436_v14 = vmax.bf16 %v2634_v13, %v1434_v10 }
 0x2b4   : > { %v1435_v15 = vadd.bf16 %v2128_v12, %v1393_v11 }
 0x2b5   : > { %v2130_v16 = vcombine.high %v1436_v14, %v1436_v14  ;;  %v2129_v17 = vcombine.low %v1436_v14, %v1436_v14 }
 0x2b6   : > { %v1437_v18 = vmax.bf16 %v2634_v13, %v1435_v15 }
 0x2b7   : > { %1868 = vmatprep.mubr.bf16.mxu1 %v2130_v16 }
 0x2b8   : > { %1869 = vmatmul.mubr.bf16.vlgmr.msra.gmra.mrb[0].mxu1 %v2129_v17  ;;  %v2132_v19 = vcombine.high %v1437_v18, %v1437_v18  ;;  %v2131_v20 = vcombine.low %v1437_v18, %v1437_v18 }
 0x2ba   : > { %1909 = vmatprep.mubr.bf16.mxu0 %v2132_v19 }
 0x2bb   : > { %1910 = vmatmul.mubr.bf16.vlgmr.msra.gmra.mrb[0].mxu0 %v2131_v20 }
 0x38b   : > { %v1870_v21 = vpop.f32.mrb[0].mxu1 }
 0x38c   : > { %v1872_v22 = vpop.f32.mrb[1].mxu1 }
 0x38d   : > { %v1874_v23 = vpop.f32.mrb[2].mxu1 }
 0x38e   : > { %v1911_v24 = vpop.f32.mrb[0].mxu0  ;;  %v1875_v1 = vpop.f32.mrb[3].mxu1 }
 0x38f   : > { %v1912_v25 = vadd.f32 %v1911_v24, %v1870_v21  ;;  %v1913_v26 = vpop.f32.mrb[1].mxu0 }
 0x390   : > { %v1914_v27 = vadd.f32 %v1913_v26, %v1872_v22  ;;  %v1915_v28 = vpop.f32.mrb[2].mxu0 }
 0x391   : > { %1918 = vst [vmem:[#allocation11] sm:$0xff] %v1912_v25  ;;  %v1916_v29 = vpop.f32.mrb[3].mxu0 }
 0x392   : > { %1919 = vst [vmem:[#allocation11 + $0x8] sm:$0xff] %v1914_v27 }
 0x393 PF: > { %p2856_p10 = scmp.eq.s32.totalorder %s2037_s21, 1  ;;  %s2635_s14 = smov [#allocation11]  }
 0x394   : > { %s1936_s15 = sshll.u32 %s2635_s14, 4  ;;  %s1937_s15 = int_to_ptr.vmem [resolvable:$true] %s1936_s15 }
 0x395   : > { %s2561_s16 = scalar_lea.vmem %s1937_s15, 256  ;;  %s2567_s17 = scalar_lea.vmem %s1937_s15, 512 }
 0x396   : > { %p2562_p11 = scmp.ne.s32.totalorder %s1937_s15, %s2561_s16  ;;  %p2568_p0 = scmp.lt.s32.totalorder %s1937_s15, %s1937_s15 }
 0x397   : > { %p2569_p1 = scmp.lt.s32.totalorder %s2567_s17, %s2561_s16 }
 0x398   : > { %p2563_p12 = pnand %p2562_p11, %p2856_p10 }
 0x399   : > { %p2570_p2 = por %p2569_p1, %p2568_p0 }
 0x39a   : > { %p2564_p13 = pneg %p2563_p12 }
 0x39c   : > { %p2571_p5 = pnand %p2570_p2, %p2564_p13 }
 0x39e   : > { %2574 = shalt.err (!%p2571_p5)
}
 0x39f   : > { %s2575_s29 = scalar_lea.hbm %s2896_s5, 256 }
 0x3a0   : > { %p2576_p6 = scmp.ne.s32.totalorder %s2896_s5, %s2575_s29  ;;  %p2581_p8 = scmp.lt.u32.totalorder %s2575_s29, %s2896_s5 }
 0x3a2   : > { %p2577_p3 = pnand %p2576_p6, %p2856_p10 }
 0x3a4   : > { %p2578_p4 = pneg %p2577_p3 }
 0x3a6   : > { %p2583_p7 = pnand %p2581_p8, %p2578_p4 }
 0x3a8   : > { %2586 = shalt.err (!%p2583_p7)
}
 0x3a9   : > { %2218 = dma.vmem_to_hbm [thread:$0]  (%p2856_p10), %s1937_s15, 256, %s2896_s5, [#allocation7]  }
 0x3aa PF: > { %p2245_p9 = scmp.eq.s32.totalorder %s2038_s22, 1  ;;  %p2919_p11 = scmp.ge.s32.totalorder %s2621_s20, 2 }
 0x3ac   : > { %p2233_p12 = pnand %p2245_p9, %p2919_p11 }
 0x3ae   : > { %2608 = dma.done.wait (!%p2233_p12), [#allocation7], 256  }
 0x3af   : > { %2610 = vsyncadd (!%p2233_p12), [#allocation7], 4294967040  ;;  %s22_s20 = sadd.s32 1, %s2621_s20   ;;  %s2920_s18 = smov %s2617_s19 }
 0x3b0   : > { %p19_p13 = scmp.ge.s32.totalorder %s22_s20, 4   ;;  %s2921_s19 = smov %s2923_s23 }
 0x3b2   :  { %21 = sbr.rel (!%p19_p13) target bundleno = 6 (0x6), region = 113 }
 0x3b9   :  { %1954 = vsyncpa [#allocation6], 1 }
 0x3ba   :  { %1956 = vsyncpa [#allocation6 + $0x1], 1 }
 0x3bb   :  { %1957 = vsyncpa [#allocation9], 1 }
 0x3bc   :  { %1958 = vsyncpa [#allocation7], 1 }
 0x3bd   :  { %1960 = vsyncpa [#allocation7 + $0x1], 1 }

</bundles_post_ra>
